<compile_context>
chip_gen: v7x
topology: tpu7x:2x2x1
jax: 0.10.0
libtpu: 0.0.40
codegen_flags: <defaults>
</compile_context>

<pallas_src>
import jax
import jax.numpy as jnp
from jax.experimental import pallas as pl
from jax.experimental.pallas import tpu as pltpu


def _maximum_kernel(x_ref, y_ref, o_ref):
    # Pure VPU elementwise max on one (BR, BC) VMEM tile.
    o_ref[...] = jnp.maximum(x_ref[...], y_ref[...])


def _round_up(x: int, m: int) -> int:
    return (x + m - 1) // m * m


def _round_down(x: int, m: int) -> int:
    return max(x // m * m, m)


def _choose_blocks(m: int, n: int, itemsize: int, block_bytes: int):
    """Pick (br, bc): bc lane-aligned (128), br sublane-aligned, preferring
    full-width blocks so each DMA is a single contiguous burst."""
    sub = max(8, 32 // itemsize)          # f32:8, bf16:16, int8/fp8:32
    elems = max(block_bytes // itemsize, sub * 128)
    m_cov = _round_up(m, sub)             # smallest aligned cover of rows
    n_cov = _round_up(n, 128)             # smallest aligned cover of cols

    # Full-width if it still leaves room for >= `sub` rows in the budget.
    bc = min(n_cov, _round_down(elems // sub, 128))
    br = min(m_cov, _round_down(elems // bc, sub))

    # v7x has 2 TensorCores: ensure a parallel axis has >= 2 blocks to shard
    # when the tensor is big enough (harmless no-op on single-TC v5e/v6e).
    if pl.cdiv(m, br) * pl.cdiv(n, bc) == 1 and m >= 2 * sub:
        br = _round_up(pl.cdiv(m, 2), sub)
    return br, bc


def elementwise_maximum(x: jax.Array, y: jax.Array, *,
                        block_bytes: int = 2 * 1024 * 1024) -> jax.Array:
    """Computes jnp.maximum(x, y) (== torch.maximum) for 2-D tensors."""
    assert x.ndim == 2 and y.ndim == 2 and x.shape == y.shape
    dtype = jnp.promote_types(x.dtype, y.dtype)   # module spec: both float32
    x = x.astype(dtype)
    y = y.astype(dtype)
    m, n = x.shape

    br, bc = _choose_blocks(m, n, jnp.dtype(dtype).itemsize, block_bytes)
    grid = (pl.cdiv(m, br), pl.cdiv(n, bc))       # ragged last blocks: Pallas masks
    spec = pl.BlockSpec((br, bc), lambda i, j: (i, j))

    return pl.pallas_call(
        _maximum_kernel,
        out_shape=jax.ShapeDtypeStruct((m, n), dtype),
        grid=grid,
        in_specs=[spec, spec],
        out_specs=spec,
        compiler_params=pltpu.CompilerParams(
            dimension_semantics=("parallel", "parallel")),
    )(x, y)


if __name__ == "__main__":
    key = jax.random.PRNGKey(0)
    k1, k2, k3, k4, k5, k6 = jax.random.split(key, 6)

    # Case 1: small, unaligned on both axes (ragged single block), with a NaN
    # to check torch.maximum-style NaN propagation.
    x1 = jax.random.normal(k1, (13, 200), dtype=jnp.float32)
    y1 = jax.random.normal(k2, (13, 200), dtype=jnp.float32)
    x1 = x1.at[3, 7].set(jnp.nan)
    o1 = jax.block_until_ready(elementwise_maximum(x1, y1))
    assert o1.shape == (13, 200)
    assert jnp.allclose(o1, jnp.maximum(x1, y1), equal_nan=True)

    # Case 2: unaligned, splits into a 2x1 grid (keeps both v7x TCs busy).
    x2 = jax.random.normal(k3, (200, 700), dtype=jnp.float32)
    y2 = jax.random.normal(k4, (200, 700), dtype=jnp.float32)
    o2 = jax.block_until_ready(elementwise_maximum(x2, y2))
    assert o2.shape == (200, 700)
    assert jnp.allclose(o2, jnp.maximum(x2, y2))

    # Case 3: fully aligned shape, multi-block with a small block budget to
    # exercise the 2-D grid path.
    x3 = jax.random.normal(k5, (128, 512), dtype=jnp.float32)
    y3 = jax.random.normal(k6, (128, 512), dtype=jnp.float32)
    o3 = jax.block_until_ready(
        elementwise_maximum(x3, y3, block_bytes=64 * 1024))
    assert o3.shape == (128, 512)
    assert jnp.allclose(o3, jnp.maximum(x3, y3))

    print("KERNEL_OK")
</pallas_src>

<mosaic_0001>
module attributes {stable_mosaic.version = 11 : i64} {
  func.func @_maximum_kernel(%arg0: i32, %arg1: i32, %arg2: memref<16x256xf32, #tpu.memory_space<vmem>>, %arg3: memref<16x256xf32, #tpu.memory_space<vmem>>, %arg4: memref<16x256xf32, #tpu.memory_space<vmem>>) attributes {dimension_semantics = [#tpu.dimension_semantics<parallel>, #tpu.dimension_semantics<parallel>], iteration_bounds = array<i64: 1, 1>, scalar_prefetch = 0 : i64, scratch_operands = 0 : i64, tpu.core_type = #tpu.core_type<tc>, window_params = [{transform_indices = @transform_0, window_bounds = array<i64: 16, 256>}, {transform_indices = @transform_1, window_bounds = array<i64: 16, 256>}, {transform_indices = @transform_2, window_bounds = array<i64: 16, 256>}]} {
    %c0 = arith.constant 0 : index
    %c0_0 = arith.constant 0 : index
    %0 = vector.load %arg2[%c0, %c0_0] : memref<16x256xf32, #tpu.memory_space<vmem>>, vector<16x256xf32>
    %c0_1 = arith.constant 0 : index
    %c0_2 = arith.constant 0 : index
    %1 = vector.load %arg3[%c0_1, %c0_2] : memref<16x256xf32, #tpu.memory_space<vmem>>, vector<16x256xf32>
    %2 = arith.maximumf %0, %1 : vector<16x256xf32>
    %c0_3 = arith.constant 0 : index
    %c0_4 = arith.constant 0 : index
    %3 = vector.load %arg4[%c0_3, %c0_4] : memref<16x256xf32, #tpu.memory_space<vmem>>, vector<16x256xf32>
    tpu.vector_store %arg4[%c0_3, %c0_4], %2 {strides = array<i32>} : memref<16x256xf32, #tpu.memory_space<vmem>>, vector<16x256xf32>,
    return
  }
  func.func @transform_0(%arg0: i32, %arg1: i32) -> (i32, i32) {
    %c0_i32 = arith.constant 0 : i32
    return %arg0, %arg1 : i32, i32
  }
  func.func @transform_1(%arg0: i32, %arg1: i32) -> (i32, i32) {
    %c0_i32 = arith.constant 0 : i32
    return %arg0, %arg1 : i32, i32
  }
  func.func @transform_2(%arg0: i32, %arg1: i32) -> (i32, i32) {
    %c0_i32 = arith.constant 0 : i32
    return %arg0, %arg1 : i32, i32
  }
}

</mosaic_0001>

<bundles_post_ra>
// kernel: tpu_custom_call.1
= control target key start
LH: loop header
LB: loop body
LE: loop exit
PB: predicated region body
PF: predicated region fallthrough
CT: control target
= control target key end

     0   :  { %7 = vsyncpa [#allocation3], 0  ;;  %s216_s0 = inlined_call_operand.hbm [shape: f32[13,200], index: 0, kind: input, shape index: {}]   ;;  %s217_s1 = inlined_call_operand.hbm [shape: f32[13,200], index: 1, kind: input, shape index: {}]   ;;  %s218_s2 = inlined_call_operand.hbm [shape: f32[13,200], index: 2, kind: output, shape index: {}]  }
   0x1   :  { %8 = vsyncpa [#allocation6], 0 }
   0x2   :  { %9 = vsyncpa [#allocation4], 0  ;;  %s151_s9 = smov [#allocation2]   ;;  %s79_s13 = scalar_lea.hbm %s216_s0, 512 }
   0x3   :  { %s15_s10 = sshll.u32 %s151_s9, 4  ;;  %p80_p0 = scmp.ne.s32.totalorder %s216_s0, %s79_s13  ;;  %s16_s10 = int_to_ptr.vmem [resolvable:$true] %s15_s10 }
   0x4   :  { %p83_p1 = scmp.lt.u32.totalorder %s79_s13, %s216_s0 }
   0x6   :  { %p85_p2 = pnand %p83_p1, %p80_p0 }
   0x8   :  { %88 = shalt.err (!%p85_p2)
}
   0x9   :  { %s89_s18 = scalar_lea.vmem %s16_s10, 512  ;;  %p94_p4 = scmp.lt.s32.totalorder %s16_s10, %s16_s10 }
   0xa   :  { %p90_p3 = scmp.ne.s32.totalorder %s16_s10, %s89_s18  ;;  %p95_p5 = scmp.lt.s32.totalorder %s89_s18, %s89_s18 }
   0xc   :  { %p96_p6 = por %p95_p5, %p94_p4 }
   0xe   :  { %p97_p7 = pnand %p96_p6, %p90_p3 }
  0x10   :  { %100 = shalt.err (!%p97_p7)
}
  0x11   :  { %s152_s19 = smov 256   ;;  %s153_s20 = smov 16  }
  0x12   :  { %21 = dma.hbm_to_vmem [thread:$0]  %s216_s0, 512, %s16_s10, [#allocation3], %s152_s19, %s152_s19, %s153_s20  }
  0x13   :  { %s154_s23 = smov [#allocation5]   ;;  %s101_s27 = scalar_lea.hbm %s217_s1, 512 }
  0x14   :  { %s27_s24 = sshll.u32 %s154_s23, 4  ;;  %p102_p8 = scmp.ne.s32.totalorder %s217_s1, %s101_s27  ;;  %s28_s24 = int_to_ptr.vmem [resolvable:$true] %s27_s24 }
  0x15   :  { %p105_p9 = scmp.lt.u32.totalorder %s101_s27, %s217_s1 }
  0x17   :  { %p107_p10 = pnand %p105_p9, %p102_p8 }
  0x19   :  { %110 = shalt.err (!%p107_p10)
}
  0x1a   :  { %s111_s4 = scalar_lea.vmem %s28_s24, 512  ;;  %p116_p12 = scmp.lt.s32.totalorder %s28_s24, %s28_s24 }
  0x1b   :  { %p112_p11 = scmp.ne.s32.totalorder %s28_s24, %s111_s4  ;;  %p117_p13 = scmp.lt.s32.totalorder %s111_s4, %s111_s4 }
  0x1d   :  { %p118_p0 = por %p117_p13, %p116_p12 }
  0x1f   :  { %p119_p1 = pnand %p118_p0, %p112_p11 }
  0x21   :  { %122 = shalt.err (!%p119_p1)
}
  0x22   :  { %33 = dma.hbm_to_vmem [thread:$0]  %s217_s1, 512, %s28_s24, [#allocation6], %s152_s19, %s152_s19, %s153_s20  }
  0x23   :  { %145 = dma.done.wait [#allocation3], 512  }
  0x24   :  { %146 = vsyncadd [#allocation3], 4294966784 }
  0x25   :  { %147 = dma.done.wait [#allocation6], 512  }
  0x26   :  { %148 = vsyncadd [#allocation6], 4294966784  ;;  %v40_v0 = vld [vmem:[#allocation2] sm:$0xff]  ;;  %v41_v2 = vld [vmem:[#allocation2 + $0x8] sm:$0xff]  ;;  %s155_s6 = smov [#allocation7]  }
  0x27   :  { %v44_v1 = vld [vmem:[#allocation5] sm:$0xff]  ;;  %s61_s7 = sshll.u32 %s155_s6, 4  ;;  %v45_v4 = vld [vmem:[#allocation5 + $0x8] sm:$0xff]  ;;  %v42_v5 = vld [vmem:[#allocation2 + $0x10] sm:$0xff]  ;;  %s62_s7 = int_to_ptr.vmem [resolvable:$true] %s61_s7 }
  0x28   :  { %v48_v3 = vmax.f32 %v40_v0, %v44_v1  ;;  %v46_v6 = vld [vmem:[#allocation5 + $0x10] sm:$0xff]  ;;  %v49_v7 = vmax.f32 %v41_v2, %v45_v4  ;;  %v43_v9 = vld [vmem:[#allocation2 + $0x18] sm:$0xff]  ;;  %s123_s1 = scalar_lea.vmem %s62_s7, 512  ;;  %p128_p3 = scmp.lt.s32.totalorder %s62_s7, %s62_s7 }
  0x29   :  { %v50_v8 = vmax.f32 %v42_v5, %v46_v6  ;;  %v47_v10 = vld [vmem:[#allocation5 + $0x18] sm:$0xff]  ;;  %p124_p2 = scmp.ne.s32.totalorder %s62_s7, %s123_s1  ;;  %p129_p4 = scmp.lt.s32.totalorder %s123_s1, %s123_s1 }
  0x2a   :  { %52 = vst [vmem:[#allocation7] sm:$0xff] %v48_v3  ;;  %v51_v11 = vmax.f32 %v43_v9, %v47_v10  ;;  %53 = vst [vmem:[#allocation7 + $0x8] sm:$0xff] %v49_v7 }
  0x2b   :  { %54 = vst [vmem:[#allocation7 + $0x10] sm:$0xff] %v50_v8  ;;  %p130_p5 = por %p129_p4, %p128_p3 }
  0x2c   :  { %55 = vst [vmem:[#allocation7 + $0x18] sm:$0xff] %v51_v11 }
  0x2d   :  { %p131_p6 = pnand %p130_p5, %p124_p2 }
  0x2f   :  { %134 = shalt.err (!%p131_p6)
}
  0x30   :  { %s135_s10 = scalar_lea.hbm %s218_s2, 512 }
  0x31   :  { %p136_p7 = scmp.ne.s32.totalorder %s218_s2, %s135_s10  ;;  %p139_p8 = scmp.lt.u32.totalorder %s135_s10, %s218_s2 }
  0x33   :  { %p141_p9 = pnand %p139_p8, %p136_p7 }
  0x35   :  { %144 = shalt.err (!%p141_p9)
}
  0x36   :  { %67 = dma.vmem_to_hbm [thread:$0]  %s62_s7, 512, %s218_s2, [#allocation4], %s152_s19, %s152_s19, %s153_s20  }
  0x37   :  { %149 = dma.done.wait [#allocation4], 512  }
  0x38   :  { %150 = vsyncadd [#allocation4], 4294966784 }
  0x39   :  { %71 = vsyncpa [#allocation3], 1 }
  0x3a   :  { %72 = vsyncpa [#allocation6], 1 }
  0x3b   :  { %73 = vsyncpa [#allocation4], 1 }

</bundles_post_ra>
